<compile_context>
chip_gen: v7x
topology: tpu7x:2x2x1
jax: 0.10.0
libtpu: 0.0.40
codegen_flags: <defaults>
</compile_context>

<pallas_src>
import functools

import jax
import jax.numpy as jnp
from jax.experimental import pallas as pl
from jax.experimental.pallas import tpu as pltpu


def _cdiv(a, b):
    return -(-a // b)


def _round_up(x, m):
    return _cdiv(x, m) * m


def _dice_kernel(x_ref, t_ref, out_ref, i_acc, y_acc, z_acc, *,
                 n_classes, apply_softmax, hw, hw_pad, rows_tile):
    # Grid: (batch b, spatial tile s).
    #   x_ref  : (1, C, rows_tile, 128)  scores, native dtype
    #   t_ref  : (1, rows_tile, 128)     int32 labels
    #   out_ref: (1, C, 1)               f32 per-(b, c) dice (written last tile)
    #   *_acc  : (C, 8, 128)             f32 vreg-shaped accumulators
    s = pl.program_id(1)

    @pl.when(s == 0)
    def _init():
        i_acc[...] = jnp.zeros_like(i_acc)
        y_acc[...] = jnp.zeros_like(y_acc)
        z_acc[...] = jnp.zeros_like(z_acc)

    x = x_ref[0].astype(jnp.float32)          # (C, rows_tile, 128)
    t = t_ref[0].astype(jnp.int32)            # (rows_tile, 128)

    if apply_softmax:
        # Channel softmax fused in-kernel. C is the leading (non-tiled) axis,
        # so max/sum over it are plain VALU maximum/add over (rows, 128) slabs;
        # the per-pixel reciprocal runs on the EUP slot.
        m = jnp.max(x, axis=0, keepdims=True)
        e = jnp.exp(x - m)
        denom = jnp.sum(e, axis=0, keepdims=True)
        p = e * pl.reciprocal(denom, approx=False)
    else:
        p = x

    if hw_pad != hw:
        # Mask padded tail pixels. Mandatory when softmax=True: softmax of the
        # zero-padded columns would otherwise contribute 1/C per class.
        row = jax.lax.broadcasted_iota(jnp.int32, (rows_tile, 128), 0)
        lane = jax.lax.broadcasted_iota(jnp.int32, (rows_tile, 128), 1)
        pix = (s * rows_tile + row) * 128 + lane
        p = p * (pix < hw).astype(jnp.float32)[None, :, :]

    # One-hot for all classes at once: (C,1,1) iota vs (rows,128) labels.
    cls = jax.lax.broadcasted_iota(jnp.int32, (n_classes, 1, 1), 0)
    onehot = (t[None, :, :] == cls).astype(jnp.float32)   # (C, rows_tile, 128)

    grp = rows_tile // 8

    def vreg_sum(v):
        # (C, rows_tile, 128) -> (C, 8, 128): reduce whole vregs against each
        # other (pure VALU adds); cross-lane/sublane reduce deferred to finalize.
        return jnp.sum(v.reshape(n_classes, grp, 8, 128), axis=1)

    i_acc[...] += vreg_sum(p * onehot)     # intersect
    y_acc[...] += vreg_sum(onehot)         # sum(t*t) == sum(t)
    z_acc[...] += vreg_sum(p * p)          # sum(s*s)

    @pl.when(s == pl.num_programs(1) - 1)
    def _finalize():
        smooth = 1e-05

        def collapse(acc):                               # (C, 8, 128) -> (C, 1)
            return jnp.sum(jnp.sum(acc[...], axis=-1), axis=-1, keepdims=True)

        inter = collapse(i_acc)
        y_sum = collapse(y_acc)
        z_sum = collapse(z_acc)
        dice = 1.0 - (2.0 * inter + smooth) / (z_sum + y_sum + smooth)  # (C, 1)
        out_ref[...] = dice[None, :, :]                                 # (1,C,1)


def _pick_rows_tile(n_rows, n_classes, itemsize, max_block_bytes=2 << 20):
    """Rows per spatial tile: sublane-aligned, ~2 MiB of x per block, balanced."""
    row_align = max(8, 32 // itemsize)          # f32: 8, bf16: 16, int8: 32
    bytes_per_row = n_classes * 128 * itemsize
    max_rows = max(row_align,
                   (max_block_bytes // bytes_per_row) // row_align * row_align)
    n_blocks = _cdiv(n_rows, max_rows)
    return _round_up(_cdiv(n_rows, n_blocks), row_align)


def dice_loss(inputs, target, weight=None, softmax=False, n_classes=4):
    """Matches DiceLoss.forward: sum_{j,i} dice(j,i) * weight[i] / n_classes."""
    B, C, H, W = inputs.shape
    assert C == n_classes, f"predict channels {C} != n_classes {n_classes}"
    assert target.shape == (B, H, W)

    HW = H * W
    R = _cdiv(HW, 128)
    itemsize = jnp.dtype(inputs.dtype).itemsize
    rows_tile = _pick_rows_tile(R, C, itemsize)
    n_tiles = _cdiv(R, rows_tile)
    R_pad = n_tiles * rows_tile
    HW_pad = R_pad * 128

    # Stream the native dtype (no wrapper-side f32 cast of the whole tensor).
    x = inputs.reshape(B, C, HW)
    if (jnp.issubdtype(target.dtype, jnp.integer)
            and jnp.dtype(target.dtype).itemsize == 4):
        t = target.reshape(B, HW)
    else:
        t = target.astype(jnp.int32).reshape(B, HW)

    if HW_pad != HW:
        x = jnp.pad(x, ((0, 0), (0, 0), (0, HW_pad - HW)))
        # Out-of-range pad label -> all-zero one-hot row.
        t = jnp.pad(t, ((0, 0), (0, HW_pad - HW)), constant_values=n_classes)

    x = x.reshape(B, C, R_pad, 128)
    t = t.reshape(B, R_pad, 128)

    kernel = functools.partial(
        _dice_kernel, n_classes=C, apply_softmax=bool(softmax),
        hw=HW, hw_pad=HW_pad, rows_tile=rows_tile)

    # Explicit VMEM budget: double-buffered inputs + accumulators + headroom.
    x_block_bytes = C * rows_tile * 128 * itemsize
    t_block_bytes = rows_tile * 128 * jnp.dtype(t.dtype).itemsize
    scratch_bytes = 3 * C * 8 * 128 * 4
    vmem_limit = int(min(2 * (x_block_bytes + t_block_bytes)
                         + scratch_bytes + (4 << 20), 64 << 20))

    per_bc_dice = pl.pallas_call(
        kernel,
        out_shape=jax.ShapeDtypeStruct((B, C, 1), jnp.float32),
        grid_spec=pltpu.PrefetchScalarGridSpec(
            num_scalar_prefetch=0,
            grid=(B, n_tiles),
            in_specs=[
                pl.BlockSpec((1, C, rows_tile, 128), lambda b, s: (b, 0, s, 0)),
                pl.BlockSpec((1, rows_tile, 128), lambda b, s: (b, s, 0)),
            ],
            out_specs=pl.BlockSpec((1, C, 1), lambda b, s: (b, 0, 0)),
            scratch_shapes=[
                pltpu.VMEM((C, 8, 128), jnp.float32),   # intersect accumulator
                pltpu.VMEM((C, 8, 128), jnp.float32),   # y_sum accumulator
                pltpu.VMEM((C, 8, 128), jnp.float32),   # z_sum accumulator
            ],
        ),
        compiler_params=pltpu.CompilerParams(
            dimension_semantics=("parallel", "arbitrary"),
            vmem_limit_bytes=vmem_limit),
    )(x, t)

    per_bc_dice = per_bc_dice.reshape(B, C)

    if weight is None:
        weight = jnp.ones((n_classes,), jnp.float32)
    else:
        weight = jnp.asarray(weight, jnp.float32)

    # TODO(synk): `class_wise_dice` (Python-side .item() bookkeeping) is not
    # part of the returned loss, so it is not reproduced here.
    # TODO(synk): for v7x with B == 1, split the spatial axis into two
    # CORE_PARALLEL halves emitting per-half (i, y, z) partials so both
    # TensorCores stay busy; the dice formula then finishes in JAX.
    return jnp.sum(per_bc_dice * weight[None, :]) / n_classes


def _dice_loss_ref(inputs, target, weight=None, softmax=False, n_classes=4):
    """Pure-JAX reference mirroring the PyTorch forward, for verification."""
    inputs = inputs.astype(jnp.float32)
    if softmax:
        inputs = jax.nn.softmax(inputs, axis=1)
    B, C, H, W = inputs.shape
    onehot = (target[:, None, :, :] == jnp.arange(C)[None, :, None, None]
              ).astype(jnp.float32)
    if weight is None:
        weight = jnp.ones((n_classes,), jnp.float32)
    else:
        weight = jnp.asarray(weight, jnp.float32)
    smooth = 1e-05
    loss = 0.0
    for j in range(B):
        for i in range(n_classes):
            score = inputs[j, i]
            tgt = onehot[j, i]
            intersect = jnp.sum(score * tgt)
            y_sum = jnp.sum(tgt * tgt)
            z_sum = jnp.sum(score * score)
            dice = 1.0 - (2.0 * intersect + smooth) / (z_sum + y_sum + smooth)
            loss = loss + dice * weight[i]
    return loss / n_classes


if __name__ == "__main__":
    B, C, H, W = 2, 4, 16, 16
    key = jax.random.PRNGKey(0)
    k1, k2 = jax.random.split(key)
    inputs = jax.random.uniform(k1, (B, C, H, W), dtype=jnp.float32)
    target = jax.random.randint(k2, (B, H, W), 0, C, dtype=jnp.int32)

    # softmax=False, default weight (exercises the padded-tail mask path too:
    # HW=256 rounds up to one (8,128) tile of 1024 pixels).
    loss = jax.block_until_ready(
        dice_loss(inputs, target, weight=None, softmax=False, n_classes=C))
    ref = _dice_loss_ref(inputs, target, weight=None, softmax=False, n_classes=C)
    assert jnp.allclose(loss, ref, atol=1e-5, rtol=1e-5), (loss, ref)

    # softmax=True (fused in-kernel), explicit weights.
    w = [1.0, 2.0, 0.5, 1.5]
    loss_sm = jax.block_until_ready(
        dice_loss(inputs, target, weight=w, softmax=True, n_classes=C))
    ref_sm = _dice_loss_ref(inputs, target, weight=w, softmax=True, n_classes=C)
    assert jnp.allclose(loss_sm, ref_sm, atol=1e-5, rtol=1e-5), (loss_sm, ref_sm)

    # Native bf16 streaming path (no wrapper-side f32 cast); reference uses the
    # same bf16-rounded values so the comparison stays tight.
    inputs_bf16 = inputs.astype(jnp.bfloat16)
    loss_bf = jax.block_until_ready(
        dice_loss(inputs_bf16, target, weight=w, softmax=True, n_classes=C))
    ref_bf = _dice_loss_ref(inputs_bf16.astype(jnp.float32), target, weight=w,
                            softmax=True, n_classes=C)
    assert jnp.allclose(loss_bf, ref_bf, atol=1e-4, rtol=1e-4), (loss_bf, ref_bf)

    print("KERNEL_OK")
</pallas_src>

<mosaic_0001>
module attributes {stable_mosaic.version = 11 : i64} {
  func.func @_dice_kernel(%arg0: i32, %arg1: i32, %arg2: memref<1x4x8x128xf32, #tpu.memory_space<vmem>>, %arg3: memref<1x8x128xi32, #tpu.memory_space<vmem>>, %arg4: memref<1x4x1xf32, #tpu.memory_space<vmem>>, %arg5: memref<4x8x128xf32, #tpu.memory_space<vmem>>, %arg6: memref<4x8x128xf32, #tpu.memory_space<vmem>>, %arg7: memref<4x8x128xf32, #tpu.memory_space<vmem>>) attributes {dimension_semantics = [#tpu.dimension_semantics<parallel>, #tpu.dimension_semantics<arbitrary>], iteration_bounds = array<i64: 2, 1>, scalar_prefetch = 0 : i64, scratch_operands = 3 : i64, tpu.core_type = #tpu.core_type<tc>, window_params = [{transform_indices = @transform_0, window_bounds = array<i64: 1, 4, 8, 128>}, {transform_indices = @transform_1, window_bounds = array<i64: 1, 8, 128>}, {transform_indices = @transform_2, window_bounds = array<i64: 1, 4, 1>}]} {
    %c0_i32 = arith.constant 0 : i32
    %0 = arith.cmpi eq, %arg1, %c0_i32 : i32
    %1 = arith.extui %0 : i1 to i32
    %c0_i32_0 = arith.constant 0 : i32
    %2 = arith.cmpi ne, %1, %c0_i32_0 : i32
    scf.if %2 {
      %cst_29 = arith.constant 0.000000e+00 : f32
      %49 = vector.broadcast %cst_29 : f32 to vector<4x8x128xf32>
      %c0_30 = arith.constant 0 : index
      %c0_31 = arith.constant 0 : index
      %c0_32 = arith.constant 0 : index
      %50 = vector.load %arg5[%c0_30, %c0_31, %c0_32] : memref<4x8x128xf32, #tpu.memory_space<vmem>>, vector<4x8x128xf32>
      tpu.vector_store %arg5[%c0_30, %c0_31, %c0_32], %49 {strides = array<i32>} : memref<4x8x128xf32, #tpu.memory_space<vmem>>, vector<4x8x128xf32>,
      %cst_33 = arith.constant 0.000000e+00 : f32
      %51 = vector.broadcast %cst_33 : f32 to vector<4x8x128xf32>
      %c0_34 = arith.constant 0 : index
      %c0_35 = arith.constant 0 : index
      %c0_36 = arith.constant 0 : index
      %52 = vector.load %arg6[%c0_34, %c0_35, %c0_36] : memref<4x8x128xf32, #tpu.memory_space<vmem>>, vector<4x8x128xf32>
      tpu.vector_store %arg6[%c0_34, %c0_35, %c0_36], %51 {strides = array<i32>} : memref<4x8x128xf32, #tpu.memory_space<vmem>>, vector<4x8x128xf32>,
      %cst_37 = arith.constant 0.000000e+00 : f32
      %53 = vector.broadcast %cst_37 : f32 to vector<4x8x128xf32>
      %c0_38 = arith.constant 0 : index
      %c0_39 = arith.constant 0 : index
      %c0_40 = arith.constant 0 : index
      %54 = vector.load %arg7[%c0_38, %c0_39, %c0_40] : memref<4x8x128xf32, #tpu.memory_space<vmem>>, vector<4x8x128xf32>
      tpu.vector_store %arg7[%c0_38, %c0_39, %c0_40], %53 {strides = array<i32>} : memref<4x8x128xf32, #tpu.memory_space<vmem>>, vector<4x8x128xf32>,
    } else {
    }
    %c0 = arith.constant 0 : index
    %c0_1 = arith.constant 0 : index
    %c0_2 = arith.constant 0 : index
    %c0_3 = arith.constant 0 : index
    %3 = vector.load %arg2[%c0, %c0_1, %c0_2, %c0_3] : memref<1x4x8x128xf32, #tpu.memory_space<vmem>>, vector<1x4x8x128xf32>
    %4 = vector.shape_cast %3 : vector<1x4x8x128xf32> to vector<4x8x128xf32>
    %c0_4 = arith.constant 0 : index
    %c0_5 = arith.constant 0 : index
    %c0_6 = arith.constant 0 : index
    %5 = vector.load %arg3[%c0_4, %c0_5, %c0_6] : memref<1x8x128xi32, #tpu.memory_space<vmem>>, vector<1x8x128xi32>
    %6 = vector.shape_cast %5 : vector<1x8x128xi32> to vector<8x128xi32>
    %7 = tpu.iota {dimensions = array<i32: 0>} : vector<8x128xi32>
    %8 = tpu.iota {dimensions = array<i32: 1>} : vector<8x128xi32>
    %c8_i32 = arith.constant 8 : i32
    %9 = arith.muli %arg1, %c8_i32 : i32
    %10 = vector.broadcast %9 : i32 to vector<8x128xi32>
    %11 = arith.addi %10, %7 : vector<8x128xi32>
    %c128_i32 = arith.constant 128 : i32
    %12 = vector.broadcast %c128_i32 : i32 to vector<8x128xi32>
    %13 = arith.muli %11, %12 : vector<8x128xi32>
    %14 = arith.addi %13, %8 : vector<8x128xi32>
    %c256_i32 = arith.constant 256 : i32
    %15 = vector.broadcast %c256_i32 : i32 to vector<8x128xi32>
    %16 = arith.cmpi slt, %14, %15 : vector<8x128xi32>
    %17 = arith.extui %16 : vector<8x128xi1> to vector<8x128xi32>
    %18 = arith.sitofp %17 : vector<8x128xi32> to vector<8x128xf32>
    %19 = vector.shape_cast %18 : vector<8x128xf32> to vector<1x8x128xf32>
    %20 = vector.broadcast %19 : vector<1x8x128xf32> to vector<4x8x128xf32>
    %21 = arith.mulf %4, %20 : vector<4x8x128xf32>
    %22 = tpu.iota {dimensions = array<i32: 0>} : vector<4x1x1xi32>
    %23 = vector.shape_cast %6 : vector<8x128xi32> to vector<1x8x128xi32>
    %24 = vector.broadcast %23 : vector<1x8x128xi32> to vector<4x8x128xi32>
    %25 = vector.broadcast %22 : vector<4x1x1xi32> to vector<4x8x128xi32>
    %26 = arith.cmpi eq, %24, %25 : vector<4x8x128xi32>
    %27 = arith.extui %26 : vector<4x8x128xi1> to vector<4x8x128xi32>
    %28 = arith.sitofp %27 : vector<4x8x128xi32> to vector<4x8x128xf32>
    %c0_7 = arith.constant 0 : index
    %c0_8 = arith.constant 0 : index
    %c0_9 = arith.constant 0 : index
    %29 = vector.load %arg5[%c0_7, %c0_8, %c0_9] : memref<4x8x128xf32, #tpu.memory_space<vmem>>, vector<4x8x128xf32>
    %30 = arith.mulf %21, %28 : vector<4x8x128xf32>
    %31 = vector.shape_cast %30 : vector<4x8x128xf32> to vector<4x1x8x128xf32>
    %cst = arith.constant dense<0.000000e+00> : vector<4x8x128xf32>
    %32 = vector.multi_reduction <add>, %31, %cst [1] : vector<4x1x8x128xf32> to vector<4x8x128xf32>
    %33 = arith.addf %29, %32 : vector<4x8x128xf32>
    %c0_10 = arith.constant 0 : index
    %c0_11 = arith.constant 0 : index
    %c0_12 = arith.constant 0 : index
    %34 = vector.load %arg5[%c0_10, %c0_11, %c0_12] : memref<4x8x128xf32, #tpu.memory_space<vmem>>, vector<4x8x128xf32>
    tpu.vector_store %arg5[%c0_10, %c0_11, %c0_12], %33 {strides = array<i32>} : memref<4x8x128xf32, #tpu.memory_space<vmem>>, vector<4x8x128xf32>,
    %c0_13 = arith.constant 0 : index
    %c0_14 = arith.constant 0 : index
    %c0_15 = arith.constant 0 : index
    %35 = vector.load %arg6[%c0_13, %c0_14, %c0_15] : memref<4x8x128xf32, #tpu.memory_space<vmem>>, vector<4x8x128xf32>
    %36 = vector.shape_cast %28 : vector<4x8x128xf32> to vector<4x1x8x128xf32>
    %cst_16 = arith.constant dense<0.000000e+00> : vector<4x8x128xf32>
    %37 = vector.multi_reduction <add>, %36, %cst_16 [1] : vector<4x1x8x128xf32> to vector<4x8x128xf32>
    %38 = arith.addf %35, %37 : vector<4x8x128xf32>
    %c0_17 = arith.constant 0 : index
    %c0_18 = arith.constant 0 : index
    %c0_19 = arith.constant 0 : index
    %39 = vector.load %arg6[%c0_17, %c0_18, %c0_19] : memref<4x8x128xf32, #tpu.memory_space<vmem>>, vector<4x8x128xf32>
    tpu.vector_store %arg6[%c0_17, %c0_18, %c0_19], %38 {strides = array<i32>} : memref<4x8x128xf32, #tpu.memory_space<vmem>>, vector<4x8x128xf32>,
    %c0_20 = arith.constant 0 : index
    %c0_21 = arith.constant 0 : index
    %c0_22 = arith.constant 0 : index
    %40 = vector.load %arg7[%c0_20, %c0_21, %c0_22] : memref<4x8x128xf32, #tpu.memory_space<vmem>>, vector<4x8x128xf32>
    %41 = arith.mulf %21, %21 : vector<4x8x128xf32>
    %42 = vector.shape_cast %41 : vector<4x8x128xf32> to vector<4x1x8x128xf32>
    %cst_23 = arith.constant dense<0.000000e+00> : vector<4x8x128xf32>
    %43 = vector.multi_reduction <add>, %42, %cst_23 [1] : vector<4x1x8x128xf32> to vector<4x8x128xf32>
    %44 = arith.addf %40, %43 : vector<4x8x128xf32>
    %c0_24 = arith.constant 0 : index
    %c0_25 = arith.constant 0 : index
    %c0_26 = arith.constant 0 : index
    %45 = vector.load %arg7[%c0_24, %c0_25, %c0_26] : memref<4x8x128xf32, #tpu.memory_space<vmem>>, vector<4x8x128xf32>
    tpu.vector_store %arg7[%c0_24, %c0_25, %c0_26], %44 {strides = array<i32>} : memref<4x8x128xf32, #tpu.memory_space<vmem>>, vector<4x8x128xf32>,
    %c0_i32_27 = arith.constant 0 : i32
    %46 = arith.cmpi eq, %arg1, %c0_i32_27 : i32
    %47 = arith.extui %46 : i1 to i32
    %c0_i32_28 = arith.constant 0 : i32
    %48 = arith.cmpi ne, %47, %c0_i32_28 : i32
    scf.if %48 {
      %c0_29 = arith.constant 0 : index
      %c0_30 = arith.constant 0 : index
      %c0_31 = arith.constant 0 : index
      %49 = vector.load %arg5[%c0_29, %c0_30, %c0_31] : memref<4x8x128xf32, #tpu.memory_space<vmem>>, vector<4x8x128xf32>
      %cst_32 = arith.constant dense<0.000000e+00> : vector<4x8xf32>
      %50 = vector.multi_reduction <add>, %49, %cst_32 [2] : vector<4x8x128xf32> to vector<4x8xf32>
      %cst_33 = arith.constant dense<0.000000e+00> : vector<4xf32>
      %51 = vector.multi_reduction <add>, %50, %cst_33 [1] : vector<4x8xf32> to vector<4xf32>
      %52 = vector.shape_cast %51 : vector<4xf32> to vector<4x1xf32>
      %c0_34 = arith.constant 0 : index
      %c0_35 = arith.constant 0 : index
      %c0_36 = arith.constant 0 : index
      %53 = vector.load %arg6[%c0_34, %c0_35, %c0_36] : memref<4x8x128xf32, #tpu.memory_space<vmem>>, vector<4x8x128xf32>
      %cst_37 = arith.constant dense<0.000000e+00> : vector<4x8xf32>
      %54 = vector.multi_reduction <add>, %53, %cst_37 [2] : vector<4x8x128xf32> to vector<4x8xf32>
      %cst_38 = arith.constant dense<0.000000e+00> : vector<4xf32>
      %55 = vector.multi_reduction <add>, %54, %cst_38 [1] : vector<4x8xf32> to vector<4xf32>
      %56 = vector.shape_cast %55 : vector<4xf32> to vector<4x1xf32>
      %c0_39 = arith.constant 0 : index
      %c0_40 = arith.constant 0 : index
      %c0_41 = arith.constant 0 : index
      %57 = vector.load %arg7[%c0_39, %c0_40, %c0_41] : memref<4x8x128xf32, #tpu.memory_space<vmem>>, vector<4x8x128xf32>
      %cst_42 = arith.constant dense<0.000000e+00> : vector<4x8xf32>
      %58 = vector.multi_reduction <add>, %57, %cst_42 [2] : vector<4x8x128xf32> to vector<4x8xf32>
      %cst_43 = arith.constant dense<0.000000e+00> : vector<4xf32>
      %59 = vector.multi_reduction <add>, %58, %cst_43 [1] : vector<4x8xf32> to vector<4xf32>
      %60 = vector.shape_cast %59 : vector<4xf32> to vector<4x1xf32>
      %cst_44 = arith.constant 2.000000e+00 : f32
      %61 = vector.broadcast %cst_44 : f32 to vector<4x1xf32>
      %62 = arith.mulf %61, %52 : vector<4x1xf32>
      %cst_45 = arith.constant 9.99999974E-6 : f32
      %63 = vector.broadcast %cst_45 : f32 to vector<4x1xf32>
      %64 = arith.addf %62, %63 : vector<4x1xf32>
      %65 = arith.addf %60, %56 : vector<4x1xf32>
      %cst_46 = arith.constant 9.99999974E-6 : f32
      %66 = vector.broadcast %cst_46 : f32 to vector<4x1xf32>
      %67 = arith.addf %65, %66 : vector<4x1xf32>
      %68 = arith.divf %64, %67 : vector<4x1xf32>
      %cst_47 = arith.constant 1.000000e+00 : f32
      %69 = vector.broadcast %cst_47 : f32 to vector<4x1xf32>
      %70 = arith.subf %69, %68 : vector<4x1xf32>
      %71 = vector.shape_cast %70 : vector<4x1xf32> to vector<1x4x1xf32>
      %c0_48 = arith.constant 0 : index
      %c0_49 = arith.constant 0 : index
      %c0_50 = arith.constant 0 : index
      %72 = vector.load %arg4[%c0_48, %c0_49, %c0_50] : memref<1x4x1xf32, #tpu.memory_space<vmem>>, vector<1x4x1xf32>
      tpu.vector_store %arg4[%c0_48, %c0_49, %c0_50], %71 {strides = array<i32>} : memref<1x4x1xf32, #tpu.memory_space<vmem>>, vector<1x4x1xf32>,
    } else {
    }
    return
  }
  func.func @transform_0(%arg0: i32, %arg1: i32) -> (i32, i32, i32, i32) {
    %c0_i32 = arith.constant 0 : i32
    %c0_i32_0 = arith.constant 0 : i32
    %c0_i32_1 = arith.constant 0 : i32
    return %arg0, %c0_i32, %arg1, %c0_i32_0 : i32, i32, i32, i32
  }
  func.func @transform_1(%arg0: i32, %arg1: i32) -> (i32, i32, i32) {
    %c0_i32 = arith.constant 0 : i32
    %c0_i32_0 = arith.constant 0 : i32
    return %arg0, %arg1, %c0_i32 : i32, i32, i32
  }
  func.func @transform_2(%arg0: i32, %arg1: i32) -> (i32, i32, i32) {
    %c0_i32 = arith.constant 0 : i32
    %c0_i32_0 = arith.constant 0 : i32
    %c0_i32_1 = arith.constant 0 : i32
    return %arg0, %c0_i32, %c0_i32_0 : i32, i32, i32
  }
}

</mosaic_0001>

<bundles_post_ra>
// kernel: tpu_custom_call.1
= control target key start
LH: loop header
LB: loop body
LE: loop exit
PB: predicated region body
PF: predicated region fallthrough
CT: control target
= control target key end

     0   :  { %7 = vsyncpa [#allocation6], 0  ;;  %s972_s0 = inlined_call_operand.hbm [shape: f32[2,4,8,128], index: 0, kind: input, shape index: {}]   ;;  %s973_s1 = inlined_call_operand.hbm [shape: s32[2,8,128], index: 1, kind: input, shape index: {}]   ;;  %s974_s2 = inlined_call_operand.vmem [shape: f32[2,4,1], index: 2, kind: output, shape index: {}]  }
   0x1   :  { %9 = vsyncpa [#allocation6 + $0x1], 0 }
   0x2   :  { %10 = vsyncpa [#allocation8], 0 }
   0x3   :  { %12 = vsyncpa [#allocation8 + $0x1], 0  ;;  %s776_s9 = smov 0   ;;  %s778_s10 = smov 0  }
   0x4   :  { %s780_s11 = smov 0   ;;  %s782_s12 = smov 0  }
   0x5   :  { %s784_s13 = smov 0   ;;  %s786_s14 = smov 0  }
   0x6 LB: > { %s554_s15 = sadd.s32 4294967295, %s754_s14   ;;  %s30_s16 = sadd.s32 1, %s750_s13  ;;  %s754_s14 = sphi %s786_s14, %s18_s14   ;;  %s750_s13 = sphi %s784_s13, %s986_s13   ;;  %s746_s12 = sphi %s782_s12, %s985_s12   ;;  %s742_s11 = sphi %s780_s11, %s984_s11   ;;  %s738_s10 = sphi %s778_s10, %s983_s10   ;;  %s734_s9 = sphi %s776_s9, %s982_s9  }
   0x7   : > { %p32_p0 = scmp.ge.s32.totalorder %s30_s16, 2  ;;  %s39_s17 = sadd.s32 1, %s742_s11 }
   0x8   : > { %p46_p1 = scmp.ne.s32.totalorder %s742_s11, %s738_s10  ;;  %p47_p2 = scmp.eq.s32.totalorder %s754_s14, 0 }
   0x9   : > { %s988_s16 = smov (%p32_p0, %s30_s16), 0  ;;  %p52_p4 = scmp.ne.s32.totalorder %s738_s10, %s734_s9 }
   0xa   : > { %p812_p3 = por %p47_p2, %p46_p1  ;;  %s34_s19 = ssub.s32 %s750_s13, %s988_s16 }
   0xb   : > { %p53_p5 = scmp.eq.s32.totalorder %s554_s15, 0  ;;  %p37_p6 = scmp.eq.s32.totalorder %s34_s19, 0 }
   0xc   : > { %p586_p8 = scmp.lt.s32.totalorder %s754_s14, 2  ;;  %s828_s22 = sand.u32 1, %s742_s11  }
   0xd   : > { %p819_p7 = por %p53_p5, %p52_p4  ;;  %s574_s23 = sshll.u32 %s750_s13, 9 }
   0xe   : > { %s825_s21 = scalar_select %p37_p6, %s742_s11, %s39_s17  }
   0xf   : > { %s977_s20 = scalar_select %p819_p7, 1, 0 }
  0x10   : > { %s558_s24 = sshll.u32 %s828_s22, 5  ;;  %s835_s27 = scalar_lea.hbm %s972_s0, %s574_s23 }
  0x11   : > { %s134_s28 = scalar_lea.vmem [#allocation5], %s558_s24  ;;  %p839_p9 = pnand %p586_p8, %p812_p3 }
  0x12   : > { %s142_s29 = sshll.u32 %s134_s28, 4  ;;  %s131_s3 = scalar_lea.sflag [#allocation6], %s828_s22  ;;  %s843_s29 = int_to_ptr.vmem [resolvable:$true] %s142_s29 }
  0x13   : > { %s640_s4 = scalar_lea.hbm %s835_s27, 512  ;;  %p642_p11 = pneg %p839_p9 }
  0x14   : > { %p641_p10 = scmp.ne.s32.totalorder %s835_s27, %s640_s4  ;;  %s645_s7 = scalar_lea.hbm %s972_s0, 1024 }
  0x15   : > { %p646_p0 = scmp.lt.u32.totalorder %s835_s27, %s972_s0  ;;  %p647_p1 = scmp.lt.u32.totalorder %s645_s7, %s640_s4 }
  0x16   : > { %p643_p12 = pnand %p642_p11, %p641_p10  ;;  %p649_p3 = scmp.lt.u32.totalorder %s640_s4, %s835_s27 }
  0x17   : > { %p648_p2 = por %p647_p1, %p646_p0 }
  0x18   : > { %p644_p13 = pneg %p643_p12 }
  0x19   : > { %p650_p4 = por %p649_p3, %p648_p2 }
  0x1b   : > { %p651_p5 = pnand %p650_p4, %p644_p13 }
  0x1d   : > { %654 = shalt.err (!%p651_p5)
}
  0x1e   : > { %s655_s15 = scalar_lea.vmem %s843_s29, 512  ;;  %s756_s17 = smov [#allocation5]  }
  0x1f   : > { %p656_p6 = scmp.ne.s32.totalorder %s843_s29, %s655_s15  ;;  %s660_s18 = sshll.u32 %s756_s17, 4  ;;  %s661_s18 = int_to_ptr.vmem [resolvable:$false] %s660_s18 }
  0x20   : > { %s662_s19 = scalar_lea.vmem %s661_s18, 1024  ;;  %p663_p12 = scmp.lt.s32.totalorder %s843_s29, %s661_s18 }
  0x21   : > { %p658_p8 = pnand %p656_p6, %p642_p11  ;;  %p664_p0 = scmp.lt.s32.totalorder %s662_s19, %s655_s15 }
  0x23   : > { %p659_p10 = pneg %p658_p8  ;;  %p665_p1 = por %p664_p0, %p663_p12 }
  0x25   : > { %p666_p2 = pnand %p665_p1, %p659_p10 }
  0x27   : > { %669 = shalt.err (!%p666_p2)
}
  0x28   : > { %s757_s23 = smov 128   ;;  %s758_s24 = smov 8  }
  0x29   : > { %582 = dma.hbm_to_vmem [thread:$0]  (!%p839_p9), %s835_s27, 512, %s843_s29, %s131_s3, %s757_s23, %s757_s23, %s758_s24  }
  0x2a   : > { %p563_p13 = scmp.ge.s32.totalorder %s754_s14, 1  ;;  %p169_p3 = scmp.lt.s32.totalorder %s754_s14, 3 }
  0x2b   : > { %s561_s25 = sshll.u32 %s828_s22, 3  ;;  %s562_s28 = sshll.u32 %s750_s13, 7 }
  0x2c   : > { %p876_p4 = pnand %p563_p13, %p169_p3  ;;  %s156_s4 = scalar_lea.vmem [#allocation7], %s561_s25 }
  0x2d   : > { %s164_s5 = sshll.u32 %s156_s4, 4  ;;  %s884_s8 = scalar_lea.hbm %s973_s1, %s562_s28  ;;  %s165_s5 = int_to_ptr.vmem [resolvable:$true] %s164_s5 }
  0x2e   : > { %s979_s26 = scalar_select %p876_p4, 1, 0 }
  0x2f   : > { %s153_s27 = scalar_lea.sflag [#allocation8], %s828_s22  ;;  %s670_s29 = scalar_lea.hbm %s884_s8, 128 }
  0x30   : > { %p671_p5 = scmp.ne.s32.totalorder %s884_s8, %s670_s29  ;;  %s675_s15 = scalar_lea.hbm %s973_s1, 256 }
  0x31   : > { %p676_p10 = scmp.lt.u32.totalorder %s884_s8, %s973_s1  ;;  %p677_p12 = scmp.lt.u32.totalorder %s675_s15, %s670_s29 }
  0x32   : > { %p673_p6 = pnand %p671_p5, %p642_p11  ;;  %p679_p1 = scmp.lt.u32.totalorder %s670_s29, %s884_s8 }
  0x33   : > { %p678_p0 = por %p677_p12, %p676_p10 }
  0x34   : > { %p674_p8 = pneg %p673_p6 }
  0x35   : > { %p680_p2 = por %p679_p1, %p678_p0 }
  0x37   : > { %p681_p13 = pnand %p680_p2, %p674_p8 }
  0x39   : > { %684 = shalt.err (!%p681_p13)
}
  0x3a   : > { %s685_s22 = scalar_lea.vmem %s165_s5, 128  ;;  %s759_s19 = smov [#allocation7]  }
  0x3b   : > { %p686_p3 = scmp.ne.s32.totalorder %s165_s5, %s685_s22  ;;  %s690_s23 = sshll.u32 %s759_s19, 4  ;;  %s691_s23 = int_to_ptr.vmem [resolvable:$false] %s690_s23 }
  0x3c   : > { %s692_s24 = scalar_lea.vmem %s691_s23, 256  ;;  %p693_p7 = scmp.lt.s32.totalorder %s165_s5, %s691_s23 }
  0x3d   : > { %p688_p5 = pnand %p686_p3, %p642_p11  ;;  %p694_p4 = scmp.lt.s32.totalorder %s692_s24, %s685_s22 }
  0x3f   : > { %p689_p6 = pneg %p688_p5  ;;  %p695_p10 = por %p694_p4, %p693_p7 }
  0x41   : > { %p696_p12 = pnand %p695_p10, %p689_p6 }
  0x43   : > { %699 = shalt.err (!%p696_p12)
}
  0x44   : > { %585 = dma.hbm_to_vmem [thread:$0]  (!%p839_p9), %s884_s8, 128, %s165_s5, %s153_s27  }
  0x45   : > { %p980_p8 = scmp.ne.s32.totalorder %s979_s26, 0 }
  0x46   : > { %s175_s25 = sand.u32 (!%p980_p8), 1, %s738_s10   ;;  %p981_p11 = scmp.ne.s32.totalorder (!%p980_p8), %s977_s20, 0 }
  0x47   : > { %173 = sbr.rel (%p980_p8) target bundleno = 416 (0x1a0), region = 28  ;;  %s564_s28 = sshll.u32 (!%p980_p8), %s175_s25, 5 }
  0x48   : > { %s176_s4 = scalar_lea.sflag (!%p980_p8), [#allocation6], %s175_s25  ;;  %s909_s6 = scalar_lea.vmem (!%p980_p8), [#allocation5], %s564_s28 }
  0x4e   : > { %725 = dma.done.wait (%p981_p11), %s176_s4, 512  }
  0x4f   : > { %727 = vsyncadd (%p981_p11), %s176_s4, 4294966784  ;;  %s565_s7 = sshll.u32 %s175_s25, 3  ;;  %s185_s30 = scalar_lea.sflag [#allocation8], %s175_s25 }
  0x50   : > { %s188_s29 = scalar_lea.vmem [#allocation7], %s565_s7 }
  0x51   : > { %729 = dma.done.wait (%p981_p11), %s185_s30, 128  }
  0x52   : > { %731 = vsyncadd (%p981_p11), %s185_s30, 4294967168  ;;  %v238_v0 = vlaneseq  ;;  %v237_v6 = vld [vmem:[%s188_s29] sm:$0xff]  ;;  %v760_v9 = vmov 0.0   ;;  %v235_v15 = vld [vmem:[%s909_s6 + $0x10] sm:$0xff]  ;;  %vm357_vm5 = vcmask 1041409   ;;  %vm359_vm6 = vcmask 1042434  }
  0x53   : > { %v233_v7 = vld [vmem:[%s909_s6] sm:$0xff]  ;;  %v234_v8 = vld [vmem:[%s909_s6 + $0x8] sm:$0xff]  ;;  %vm254_vm0 = vcmp.eq.s32.totalorder %v237_v6, 0  ;;  %vm255_vm1 = vcmp.eq.s32.totalorder %v237_v6, 1  ;;  %vm256_vm3 = vcmp.eq.s32.totalorder %v237_v6, 2  ;;  %v236_v20 = vld [vmem:[%s909_s6 + $0x18] sm:$0xff] }
  0x54   : > { %v239_v1 = vshrl.u32 %v238_v0, 7  ;;  %v241_v2 = vand.u32 127, %v238_v0  ;;  %v568_v10 = vsel %vm254_vm0, 1.0, %v760_v9  ;;  %v569_v14 = vsel %vm255_vm1, 1.0, %v760_v9  ;;  %p213_p7 = scmp.lt.s32.totalorder %s746_s12, 1 }
  0x55   : > { %372 = vadd.xlane.f32.xlu0 %v568_v10  ;;  %v570_v19 = vsel %vm256_vm3, 1.0, %v760_v9  ;;  %vm257_vm4 = vcmp.eq.s32.totalorder %v237_v6, 3  ;;  %vm361_vm7 = vcmask 1043459   ;;  %vm364_vm8 = vcmask 60416  }
  0x56   : > { %v245_v3 = vmul.u32 128, %v239_v1  ;;  %v919_v4 = vsub.s32 %v241_v2, %v239_v1  ;;  %v571_v23 = vsel %vm257_vm4, 1.0, %v760_v9  ;;  %s990_s12 = smov (!%p213_p7, %s746_s12), 1  ;;  %vm453_vm9 = vcmask 3072  }
  0x57   : > { %s566_s20 = sshll.u32 %s990_s12, 2 }
  0x58   : > { %v246_v5 = vadd.s32 %v245_v3, %v241_v2  ;;  %s216_s8 = scalar_lea.vmem %s974_s2, %s566_s20 }
  0x59   : > { %374 = vadd.xlane.f32.xlu0 %v569_v14 }
  0x5a   : > { %vm247_vm2 = vcmp.lt.s32.totalorder %v246_v5, 256 }
  0x5b   : > { %v567_v11 = vsel %vm247_vm2, 1.0, %v760_v9 }
  0x5c   : > { %v250_v12 = vmul.f32 %v567_v11, %v233_v7  ;;  %v251_v13 = vmul.f32 %v567_v11, %v234_v8  ;;  %v252_v18 = vmul.f32 %v567_v11, %v235_v15  ;;  %v253_v22 = vmul.f32 %v567_v11, %v236_v20 }
  0x5d   : > { %376 = vadd.xlane.f32.xlu0 %v570_v19 }
  0x5e   : > { %v306_v16 = vmul.f32 %v250_v12, %v250_v12  ;;  %v307_v17 = vmul.f32 %v251_v13, %v251_v13  ;;  %v308_v21 = vmul.f32 %v252_v18, %v252_v18  ;;  %v309_v24 = vmul.f32 %v253_v22, %v253_v22 }
  0x5f   : > { %v270_v25 = vmul.f32 %v568_v10, %v250_v12  ;;  %v271_v26 = vmul.f32 %v569_v14, %v251_v13  ;;  %v272_v27 = vmul.f32 %v570_v19, %v252_v18  ;;  %v273_v28 = vmul.f32 %v571_v23, %v253_v22 }
  0x60   : > { %411 = vadd.xlane.f32.xlu1 %v306_v16 }
  0x61   : > { %378 = vadd.xlane.f32.xlu0 %v571_v23 }
  0x64   : > { %413 = vadd.xlane.f32.xlu1 %v307_v17 }
  0x65   : > { %329 = vadd.xlane.f32.xlu0 %v270_v25 }
  0x68   : > { %415 = vadd.xlane.f32.xlu1 %v308_v21 }
  0x69   : > { %333 = vadd.xlane.f32.xlu0 %v272_v27 }
  0x6c   : > { %417 = vadd.xlane.f32.xlu1 %v309_v24 }
  0x70   : > { %331 = vadd.xlane.f32.xlu1 %v271_v26 }
  0x74   : > { %335 = vadd.xlane.f32.xlu1 %v273_v28 }
  0xe2   : > { %v373_v29 = vpop.xlane.xlu0 %372 }
  0xe3   : > { %v387_v34 = vrot.slane %v373_v29, %v919_v4 }
  0xe6   : > { %v375_v30 = vpop.xlane.xlu0 %374 }
  0xe7   : > { %v391_v35 = vrot.slane %v375_v30, %v919_v4 }
  0xe9   : > { %v400_v39 = vsel %vm357_vm5, %v391_v35, %v387_v34 }
  0xea   : > { %v377_v32 = vpop.xlane.xlu0 %376 }
  0xeb   : > { %v395_v36 = vrot.slane %v377_v32, %v919_v4 }
  0xed   : > { %v412_v31 = vpop.xlane.xlu1 %411  ;;  %v401_v43 = vsel %vm359_vm6, %v395_v36, %v400_v39 }
  0xee   : > { %v379_v37 = vpop.xlane.xlu0 %378  ;;  %v426_v44 = vrot.slane %v412_v31, %v919_v4 }
  0xef   : > { %v399_v41 = vrot.slane %v379_v37, %v919_v4 }
  0xf1   : > { %v414_v33 = vpop.xlane.xlu1 %413  ;;  %v402_v45 = vsel %vm361_vm7, %v399_v41, %v401_v43 }
  0xf2   : > { %v430_v40 = vrot.slane %v414_v33, %v919_v4  ;;  %v404_v47 = vsel %vm364_vm8, %v402_v45, 0.0  ;;  %v330_v48 = vpop.xlane.xlu0 %329 }
  0xf3   : > { %405 = vadd.xlane.f32.xlu0 %v404_v47  ;;  %v344_v52 = vrot.slane %v330_v48, %v919_v4 }
  0xf4   : > { %v439_v49 = vsel %vm357_vm5, %v430_v40, %v426_v44 }
  0xf5   : > { %v416_v38 = vpop.xlane.xlu1 %415 }
  0xf6   : > { %v434_v42 = vrot.slane %v416_v38, %v919_v4  ;;  %v334_v56 = vpop.xlane.xlu0 %333 }
  0xf7   : > { %v352_v58 = vrot.slane %v334_v56, %v919_v4 }
  0xf8   : > { %v440_v51 = vsel %vm359_vm6, %v434_v42, %v439_v49 }
  0xf9   : > { %v418_v46 = vpop.xlane.xlu1 %417 }
  0xfa   : > { %v438_v50 = vrot.slane %v418_v46, %v919_v4 }
  0xfc   : > { %v441_v53 = vsel %vm361_vm7, %v438_v50, %v440_v51 }
  0xfd   : > { %v332_v54 = vpop.xlane.xlu1 %331  ;;  %v443_v55 = vsel %vm364_vm8, %v441_v53, 0.0 }
  0xfe   : > { %v348_v57 = vrot.slane %v332_v54, %v919_v4  ;;  %444 = vadd.xlane.f32.xlu1 %v443_v55 }
 0x100   : > { %v358_v59 = vsel %vm357_vm5, %v348_v57, %v344_v52 }
 0x101   : > { %v336_v60 = vpop.xlane.xlu1 %335  ;;  %v360_v61 = vsel %vm359_vm6, %v352_v58, %v358_v59 }
 0x102   : > { %v356_v62 = vrot.slane %v336_v60, %v919_v4 }
 0x104   : > { %v362_v63 = vsel %vm361_vm7, %v356_v62, %v360_v61 }
 0x105   : > { %v365_v0 = vsel %vm364_vm8, %v362_v63, 0.0 }
 0x106   : > { %366 = vadd.xlane.f32.xlu0 %v365_v0 }
 0x180   : > { %v406_v1 = vpop.xlane.xlu0 %405 }
 0x18b   : > { %v445_v2 = vpop.xlane.xlu1 %444 }
 0x18c   : > { %v448_v3 = vadd.f32 %v445_v2, %v406_v1 }
 0x18e   : > { %v449_v5 = vadd.f32 1e-05, %v448_v3 }
 0x190   : > { %638 = vrcp.f32 %v449_v5 }
 0x193   : > { %v367_v6 = vpop.xlane.xlu0 %366 }
 0x194   : > { %v446_v7 = vmul.f32 2.0, %v367_v6 }
 0x196   : > { %v447_v8 = vadd.f32 1e-05, %v446_v7 }
 0x19a   : > { %v639_v9 = vpop.eup %638 }
 0x19b   : > { %v451_v10 = vmul.f32 %v639_v9, %v447_v8 }
 0x19d   : > { %v452_v4 = vsub.f32 1.0, %v451_v10 }
 0x19f   : > { %454 = vst.msk [vmem:[%s216_s8] sm:$0xf] %vm453_vm9, %v452_v4 }
 0x1a0 PF: > { %s18_s14 = sadd.s32 1, %s754_s14   ;;  %s982_s9 = smov %s738_s10 }
 0x1a1   : > { %p15_p9 = scmp.ge.s32.totalorder %s18_s14, 4   ;;  %s983_s10 = smov %s742_s11 }
 0x1a2   : > { %s984_s11 = smov %s825_s21  ;;  %s985_s12 = smov %s750_s13 }
 0x1a3   : > { %s986_s13 = smov %s988_s16  ;;  %17 = sbr.rel (!%p15_p9) target bundleno = 6 (0x6), region = 89 }
 0x1aa   :  { %474 = vsyncpa [#allocation6], 1 }
 0x1ab   :  { %476 = vsyncpa [#allocation6 + $0x1], 1 }
 0x1ac   :  { %477 = vsyncpa [#allocation8], 1 }
 0x1ad   :  { %479 = vsyncpa [#allocation8 + $0x1], 1 }

</bundles_post_ra>
